<compile_context>
chip_gen: v5e
topology: v5e:2x2
jax: 0.10.0
libtpu: 0.0.40
codegen_flags: <defaults>
</compile_context>

<pallas_src>
import functools

import jax
import jax.numpy as jnp
from jax.experimental import pallas as pl
from jax.experimental.pallas import tpu as pltpu


def _critic_kernel(*refs, has_actions: bool):
    if has_actions:
        (s_ref, a_ref, w1s_ref, w1a_ref, b1_ref,
         w2_ref, b2_ref, w3_ref, b3_ref, out_ref) = refs
        h1 = jnp.dot(s_ref[...], w1s_ref[...], preferred_element_type=jnp.float32)
        h1 = h1 + jnp.dot(a_ref[...], w1a_ref[...], preferred_element_type=jnp.float32)
    else:
        (s_ref, w1s_ref, b1_ref,
         w2_ref, b2_ref, w3_ref, b3_ref, out_ref) = refs
        h1 = jnp.dot(s_ref[...], w1s_ref[...], preferred_element_type=jnp.float32)

    # Bias + ReLU in f32 (v5e VPU has no bf16 path), then downcast for the MXU.
    h1 = jnp.maximum(h1 + b1_ref[...], 0.0).astype(w2_ref.dtype)
    h2 = jnp.dot(h1, w2_ref[...], preferred_element_type=jnp.float32) + b2_ref[...]
    h2 = jnp.maximum(h2, 0.0)

    # Value head (out_features == 1): VPU multiply + lane reduction instead of a
    # 1-column MXU matmul (<1% MXU utilization). w3 is the (1, H) torch row.
    v = jnp.sum(h2 * w3_ref[...], axis=-1, keepdims=True) + b3_ref[...]
    out_ref[...] = v.astype(out_ref.dtype)


def _round_up(x, m):
    return ((x + m - 1) // m) * m


def continuous_critic_forward(states, actions, params,
                              compute_dtype=jnp.float32, batch_tile=512):
    """values = value_head(mlp(cat(states, actions))) as a single fused kernel."""
    w1, b1, w2, b2, w3, b3 = params
    batch, state_dim = states.shape
    hidden = w2.shape[0]
    has_actions = actions is not None
    action_dim = actions.shape[-1] if has_actions else 0
    in_dim = state_dim + action_dim

    # Batch tile: >=128 rows (lane/sublane friendly, amortizes the ~0.35us grid
    # step overhead), capped so large batches pipeline over a multi-tile grid.
    tb = min(batch_tile, _round_up(batch, 128))
    b_pad = _round_up(batch, tb)

    def prep_rows(x):
        x = x.astype(compute_dtype)
        if b_pad != batch:
            x = jnp.pad(x, ((0, b_pad - batch), (0, 0)))
        return x

    s = prep_rows(states)
    b1f = b1.astype(jnp.float32)
    b2f = b2.astype(jnp.float32)
    w3f = w3.astype(jnp.float32)
    b3f = b3.astype(jnp.float32)
    w2c = w2.astype(compute_dtype)

    row_spec = lambda d: pl.BlockSpec((tb, d), lambda i: (i, 0))           # streamed
    res_spec = lambda arr: pl.BlockSpec(arr.shape, lambda i: (0,) * arr.ndim)  # VMEM-resident

    if has_actions:
        # Fused concat: split the first-layer weight along its input dimension.
        w1s = w1[:state_dim].astype(compute_dtype)
        w1a = w1[state_dim:].astype(compute_dtype)
        a = prep_rows(actions)
        args = (s, a, w1s, w1a, b1f, w2c, b2f, w3f, b3f)
        in_specs = [row_spec(state_dim), row_spec(action_dim),
                    res_spec(w1s), res_spec(w1a), res_spec(b1f),
                    res_spec(w2c), res_spec(b2f), res_spec(w3f), res_spec(b3f)]
    else:
        w1s = w1.astype(compute_dtype)
        args = (s, w1s, b1f, w2c, b2f, w3f, b3f)
        in_specs = [row_spec(state_dim),
                    res_spec(w1s), res_spec(b1f),
                    res_spec(w2c), res_spec(b2f), res_spec(w3f), res_spec(b3f)]

    itemsize = jnp.dtype(compute_dtype).itemsize
    cost = pl.CostEstimate(
        flops=2 * batch * (in_dim * hidden + hidden * hidden + hidden),
        transcendentals=0,
        bytes_accessed=int(b_pad * in_dim * itemsize            # streamed inputs
                           + (in_dim + hidden) * hidden * itemsize  # matmul weights
                           + (3 * hidden + 1) * 4                   # biases + value row
                           + b_pad * 4),                            # output column
    )

    out = pl.pallas_call(
        functools.partial(_critic_kernel, has_actions=has_actions),
        out_shape=jax.ShapeDtypeStruct((b_pad, 1), jnp.float32),
        grid=(b_pad // tb,),
        in_specs=in_specs,
        out_specs=pl.BlockSpec((tb, 1), lambda i: (i, 0)),
        compiler_params=pltpu.CompilerParams(
            dimension_semantics=("parallel",)),  # v7x: shard batch tiles over both TCs
        cost_estimate=cost,
    )(*args)
    return out[:batch]


def init_params(key, in_dim, hidden_size):
    """Deterministic synthetic parameters (shapes mirror the torch module).

    Weights are stored [in_features, out_features] (x @ W convention); the value
    head is kept as the (1, hidden) torch row so the kernel can use it directly.
    """
    k1, k2, k3, k4, k5, k6 = jax.random.split(key, 6)
    s1 = 1.0 / jnp.sqrt(in_dim)
    s2 = 1.0 / jnp.sqrt(hidden_size)
    w1 = jax.random.uniform(k1, (in_dim, hidden_size), jnp.float32, -s1, s1)
    b1 = jax.random.uniform(k2, (1, hidden_size), jnp.float32, -s1, s1)
    w2 = jax.random.uniform(k3, (hidden_size, hidden_size), jnp.float32, -s2, s2)
    b2 = jax.random.uniform(k4, (1, hidden_size), jnp.float32, -s2, s2)
    w3 = jax.random.uniform(k5, (1, hidden_size), jnp.float32, -s2, s2)
    b3 = jax.random.uniform(k6, (1, 1), jnp.float32, -s2, s2)
    return (w1, b1, w2, b2, w3, b3)


def _reference(states, actions, params, compute_dtype=jnp.float32):
    """Pure-JAX reference (same dtype policy as the kernel) for correctness."""
    w1, b1, w2, b2, w3, b3 = params
    x = states if actions is None else jnp.concatenate((states, actions), axis=-1)
    x = x.astype(compute_dtype)
    h = jnp.dot(x, w1.astype(compute_dtype), preferred_element_type=jnp.float32) + b1
    h = jnp.maximum(h, 0.0).astype(compute_dtype)
    h = jnp.dot(h, w2.astype(compute_dtype), preferred_element_type=jnp.float32) + b2
    h = jnp.maximum(h, 0.0)
    return jnp.dot(h, w3.T) + b3


if __name__ == "__main__":
    key = jax.random.PRNGKey(0)
    k_s, k_a, k_p, k_s2, k_a2 = jax.random.split(key, 5)

    state_dim, action_dim, hidden = 12, 4, 32
    fwd = jax.jit(continuous_critic_forward,
                  static_argnames=("compute_dtype", "batch_tile"))

    # Tolerances are loose-ish because TPU f32 matmuls (XLA default precision)
    # and the kernel's split-K accumulation differ at the ~1e-3 level; a real
    # bug would show up as O(0.1+) error.

    # --- Test 1: small batch, f32, state+action (the module's main path) ---
    batch = 8
    states = jax.random.normal(k_s, (batch, state_dim), jnp.float32)
    actions = jax.random.normal(k_a, (batch, action_dim), jnp.float32)
    params = init_params(k_p, state_dim + action_dim, hidden)
    out = jax.block_until_ready(fwd(states, actions, params))
    ref = _reference(states, actions, params)
    assert out.shape == (batch, 1)
    assert jnp.allclose(out, ref, atol=1e-2, rtol=1e-2), "f32 small-batch mismatch"

    # --- Test 2: large batch exercising the batch grid + padding (grid=2) ---
    batch2 = 1000
    states2 = jax.random.normal(k_s2, (batch2, state_dim), jnp.float32)
    actions2 = jax.random.normal(k_a2, (batch2, action_dim), jnp.float32)
    out2 = jax.block_until_ready(fwd(states2, actions2, params))
    ref2 = _reference(states2, actions2, params)
    assert out2.shape == (batch2, 1)
    assert jnp.allclose(out2, ref2, atol=1e-2, rtol=1e-2), "f32 gridded mismatch"

    # --- Test 3: bf16 compute path (halved HBM traffic), vs bf16 reference ---
    out3 = jax.block_until_ready(fwd(states2, actions2, params,
                                     compute_dtype=jnp.bfloat16))
    ref3 = _reference(states2, actions2, params, compute_dtype=jnp.bfloat16)
    assert jnp.allclose(out3, ref3, atol=2e-2, rtol=2e-2), "bf16 mismatch"

    # --- Test 4: actions=None path (critic on states only) ---
    params_s = init_params(jax.random.PRNGKey(1), state_dim, hidden)
    out4 = jax.block_until_ready(fwd(states, None, params_s))
    ref4 = _reference(states, None, params_s)
    assert out4.shape == (batch, 1)
    assert jnp.allclose(out4, ref4, atol=1e-2, rtol=1e-2), "states-only mismatch"

    print("KERNEL_OK")
</pallas_src>

<mosaic_0001>
module attributes {stable_mosaic.version = 11 : i64} {
  func.func @_critic_kernel(%arg0: i32, %arg1: memref<128x12xf32, #tpu.memory_space<vmem>>, %arg2: memref<128x4xf32, #tpu.memory_space<vmem>>, %arg3: memref<12x32xf32, #tpu.memory_space<vmem>>, %arg4: memref<4x32xf32, #tpu.memory_space<vmem>>, %arg5: memref<1x32xf32, #tpu.memory_space<vmem>>, %arg6: memref<32x32xf32, #tpu.memory_space<vmem>>, %arg7: memref<1x32xf32, #tpu.memory_space<vmem>>, %arg8: memref<1x32xf32, #tpu.memory_space<vmem>>, %arg9: memref<1x1xf32, #tpu.memory_space<vmem>>, %arg10: memref<128x1xf32, #tpu.memory_space<vmem>>) attributes {dimension_semantics = [#tpu.dimension_semantics<parallel>], iteration_bounds = array<i64: 1>, scalar_prefetch = 0 : i64, scratch_operands = 0 : i64, tpu.core_type = #tpu.core_type<tc>, window_params = [{transform_indices = @transform_0, window_bounds = array<i64: 128, 12>}, {transform_indices = @transform_1, window_bounds = array<i64: 128, 4>}, {pipeline_mode = #tpu.pipeline_mode<synchronous>, transform_indices = @transform_2, window_bounds = array<i64: 12, 32>}, {pipeline_mode = #tpu.pipeline_mode<synchronous>, transform_indices = @transform_3, window_bounds = array<i64: 4, 32>}, {pipeline_mode = #tpu.pipeline_mode<synchronous>, transform_indices = @transform_4, window_bounds = array<i64: 1, 32>}, {pipeline_mode = #tpu.pipeline_mode<synchronous>, transform_indices = @transform_5, window_bounds = array<i64: 32, 32>}, {pipeline_mode = #tpu.pipeline_mode<synchronous>, transform_indices = @transform_6, window_bounds = array<i64: 1, 32>}, {pipeline_mode = #tpu.pipeline_mode<synchronous>, transform_indices = @transform_7, window_bounds = array<i64: 1, 32>}, {pipeline_mode = #tpu.pipeline_mode<synchronous>, transform_indices = @transform_8, window_bounds = array<i64: 1, 1>}, {transform_indices = @transform_9, window_bounds = array<i64: 128, 1>}]} {
    %c0 = arith.constant 0 : index
    %c0_0 = arith.constant 0 : index
    %0 = vector.load %arg1[%c0, %c0_0] : memref<128x12xf32, #tpu.memory_space<vmem>>, vector<128x12xf32>
    %c0_1 = arith.constant 0 : index
    %c0_2 = arith.constant 0 : index
    %1 = vector.load %arg3[%c0_1, %c0_2] : memref<12x32xf32, #tpu.memory_space<vmem>>, vector<12x32xf32>
    %cst = arith.constant dense<0.000000e+00> : vector<128x32xf32>
    %2 = tpu.matmul %0, %1, %cst {dimension_numbers = #tpu.dot_dimension_numbers<[1], [0], [0], [1], [0, 0, 1, 1], [], []>} : vector<128x12xf32>, vector<12x32xf32>, vector<128x32xf32> -> vector<128x32xf32>
    %c0_3 = arith.constant 0 : index
    %c0_4 = arith.constant 0 : index
    %3 = vector.load %arg2[%c0_3, %c0_4] : memref<128x4xf32, #tpu.memory_space<vmem>>, vector<128x4xf32>
    %c0_5 = arith.constant 0 : index
    %c0_6 = arith.constant 0 : index
    %4 = vector.load %arg4[%c0_5, %c0_6] : memref<4x32xf32, #tpu.memory_space<vmem>>, vector<4x32xf32>
    %cst_7 = arith.constant dense<0.000000e+00> : vector<128x32xf32>
    %5 = tpu.matmul %3, %4, %cst_7 {dimension_numbers = #tpu.dot_dimension_numbers<[1], [0], [0], [1], [0, 0, 1, 1], [], []>} : vector<128x4xf32>, vector<4x32xf32>, vector<128x32xf32> -> vector<128x32xf32>
    %6 = arith.addf %2, %5 : vector<128x32xf32>
    %c0_8 = arith.constant 0 : index
    %c0_9 = arith.constant 0 : index
    %7 = vector.load %arg5[%c0_8, %c0_9] : memref<1x32xf32, #tpu.memory_space<vmem>>, vector<1x32xf32>
    %8 = vector.broadcast %7 : vector<1x32xf32> to vector<128x32xf32>
    %9 = arith.addf %6, %8 : vector<128x32xf32>
    %cst_10 = arith.constant 0.000000e+00 : f32
    %10 = vector.broadcast %cst_10 : f32 to vector<128x32xf32>
    %11 = arith.maximumf %9, %10 : vector<128x32xf32>
    %c0_11 = arith.constant 0 : index
    %c0_12 = arith.constant 0 : index
    %12 = vector.load %arg6[%c0_11, %c0_12] : memref<32x32xf32, #tpu.memory_space<vmem>>, vector<32x32xf32>
    %cst_13 = arith.constant dense<0.000000e+00> : vector<128x32xf32>
    %13 = tpu.matmul %11, %12, %cst_13 {dimension_numbers = #tpu.dot_dimension_numbers<[1], [0], [0], [1], [0, 0, 1, 1], [], []>} : vector<128x32xf32>, vector<32x32xf32>, vector<128x32xf32> -> vector<128x32xf32>
    %c0_14 = arith.constant 0 : index
    %c0_15 = arith.constant 0 : index
    %14 = vector.load %arg7[%c0_14, %c0_15] : memref<1x32xf32, #tpu.memory_space<vmem>>, vector<1x32xf32>
    %15 = vector.broadcast %14 : vector<1x32xf32> to vector<128x32xf32>
    %16 = arith.addf %13, %15 : vector<128x32xf32>
    %cst_16 = arith.constant 0.000000e+00 : f32
    %17 = vector.broadcast %cst_16 : f32 to vector<128x32xf32>
    %18 = arith.maximumf %16, %17 : vector<128x32xf32>
    %c0_17 = arith.constant 0 : index
    %c0_18 = arith.constant 0 : index
    %19 = vector.load %arg8[%c0_17, %c0_18] : memref<1x32xf32, #tpu.memory_space<vmem>>, vector<1x32xf32>
    %20 = vector.broadcast %19 : vector<1x32xf32> to vector<128x32xf32>
    %21 = arith.mulf %18, %20 : vector<128x32xf32>
    %cst_19 = arith.constant dense<0.000000e+00> : vector<128xf32>
    %22 = vector.multi_reduction <add>, %21, %cst_19 [1] : vector<128x32xf32> to vector<128xf32>
    %23 = vector.shape_cast %22 : vector<128xf32> to vector<128x1xf32>
    %c0_20 = arith.constant 0 : index
    %c0_21 = arith.constant 0 : index
    %24 = vector.load %arg9[%c0_20, %c0_21] : memref<1x1xf32, #tpu.memory_space<vmem>>, vector<1x1xf32>
    %25 = vector.broadcast %24 : vector<1x1xf32> to vector<128x1xf32>
    %26 = arith.addf %23, %25 : vector<128x1xf32>
    %c0_22 = arith.constant 0 : index
    %c0_23 = arith.constant 0 : index
    %27 = vector.load %arg10[%c0_22, %c0_23] : memref<128x1xf32, #tpu.memory_space<vmem>>, vector<128x1xf32>
    tpu.vector_store %arg10[%c0_22, %c0_23], %26 {strides = array<i32>} : memref<128x1xf32, #tpu.memory_space<vmem>>, vector<128x1xf32>,
    return
  }
  func.func @transform_0(%arg0: i32) -> (i32, i32) {
    %c0_i32 = arith.constant 0 : i32
    %c0_i32_0 = arith.constant 0 : i32
    return %arg0, %c0_i32 : i32, i32
  }
  func.func @transform_1(%arg0: i32) -> (i32, i32) {
    %c0_i32 = arith.constant 0 : i32
    %c0_i32_0 = arith.constant 0 : i32
    return %arg0, %c0_i32 : i32, i32
  }
  func.func @transform_2(%arg0: i32) -> (i32, i32) {
    %c0_i32 = arith.constant 0 : i32
    %c0_i32_0 = arith.constant 0 : i32
    %c0_i32_1 = arith.constant 0 : i32
    return %c0_i32, %c0_i32_0 : i32, i32
  }
  func.func @transform_3(%arg0: i32) -> (i32, i32) {
    %c0_i32 = arith.constant 0 : i32
    %c0_i32_0 = arith.constant 0 : i32
    %c0_i32_1 = arith.constant 0 : i32
    return %c0_i32, %c0_i32_0 : i32, i32
  }
  func.func @transform_4(%arg0: i32) -> (i32, i32) {
    %c0_i32 = arith.constant 0 : i32
    %c0_i32_0 = arith.constant 0 : i32
    %c0_i32_1 = arith.constant 0 : i32
    return %c0_i32, %c0_i32_0 : i32, i32
  }
  func.func @transform_5(%arg0: i32) -> (i32, i32) {
    %c0_i32 = arith.constant 0 : i32
    %c0_i32_0 = arith.constant 0 : i32
    %c0_i32_1 = arith.constant 0 : i32
    return %c0_i32, %c0_i32_0 : i32, i32
  }
  func.func @transform_6(%arg0: i32) -> (i32, i32) {
    %c0_i32 = arith.constant 0 : i32
    %c0_i32_0 = arith.constant 0 : i32
    %c0_i32_1 = arith.constant 0 : i32
    return %c0_i32, %c0_i32_0 : i32, i32
  }
  func.func @transform_7(%arg0: i32) -> (i32, i32) {
    %c0_i32 = arith.constant 0 : i32
    %c0_i32_0 = arith.constant 0 : i32
    %c0_i32_1 = arith.constant 0 : i32
    return %c0_i32, %c0_i32_0 : i32, i32
  }
  func.func @transform_8(%arg0: i32) -> (i32, i32) {
    %c0_i32 = arith.constant 0 : i32
    %c0_i32_0 = arith.constant 0 : i32
    %c0_i32_1 = arith.constant 0 : i32
    return %c0_i32, %c0_i32_0 : i32, i32
  }
  func.func @transform_9(%arg0: i32) -> (i32, i32) {
    %c0_i32 = arith.constant 0 : i32
    %c0_i32_0 = arith.constant 0 : i32
    return %arg0, %c0_i32 : i32, i32
  }
}

</mosaic_0001>

<bundles_post_ra>
// kernel: continuous_critic_forward.1
= control target key start
LH: loop header
LB: loop body
LE: loop exit
PB: predicated region body
PF: predicated region fallthrough
CT: control target
= control target key end

     0   :  { %vm118_vm0 = vcmask 1043456   ;;  %vm69_vm1 = vcmask 31744   ;;  %vm187_vm2 = vcmask 97280   ;;  %vm348_vm3 = vcmask 261120   ;;  %s1013_s3 = inlined_call_operand.vmem [shape: f32[4,32], index: 3, kind: input, shape index: {}]   ;;  %s1014_s2 = inlined_call_operand.vmem [shape: f32[12,32], index: 2, kind: input, shape index: {}]   ;;  %s1015_s1 = inlined_call_operand.vmem [shape: f32[128,4], index: 1, kind: input, shape index: {}]   ;;  %s1016_s0 = inlined_call_operand.vmem [shape: f32[128,12], index: 0, kind: input, shape index: {}]   ;;  %s1017_s4 = inlined_call_operand.vmem [shape: f32[1,32], index: 4, kind: input, shape index: {}]   ;;  %s1018_s5 = inlined_call_operand.vmem [shape: f32[32,32], index: 5, kind: input, shape index: {}]   ;;  %s1019_s6 = inlined_call_operand.vmem [shape: f32[1,32], index: 6, kind: input, shape index: {}]   ;;  %s1020_s7 = inlined_call_operand.vmem [shape: f32[1,32], index: 7, kind: input, shape index: {}]   ;;  %s1021_s8 = inlined_call_operand.<no memory space> [shape: f32[1,1], index: 8, kind: input, shape index: {}]   ;;  %s1022_s9 = inlined_call_operand.vmem [shape: f32[128,1], index: 9, kind: output, shape index: {}]  }
   0x1   :  { %v68_v0 = vld [vmem:[%s1013_s3] sm:$0xf]  ;;  %v51_v1 = vld [vmem:[%s1014_s2 + $0x8] sm:$0xf]  ;;  %v66_v8 = vld [vmem:[%s1015_s1 + $0x70] sm:$0xff]  ;;  %vm566_vm4 = vcmask 7168  }
   0x2   :  { %v52_v2 = vld [vmem:[%s1015_s1] sm:$0xff]  ;;  %587 = vmatpush.msk.msra.mxu0 %vm118_vm0, %v68_v0  ;;  %604 = vmatpush.msk.msra.mxu1 %vm118_vm0, %v51_v1  ;;  %v65_v5 = vld [vmem:[%s1015_s1 + $0x68] sm:$0xff]  ;;  %v54_v9 = vld [vmem:[%s1015_s1 + $0x10] sm:$0xff] }
   0x3   :  { %v50_v3 = vld [vmem:[%s1014_s2] sm:$0xff]  ;;  %588 = vmatmul.msk.f32.vlgmr.msra.gmra.mxu0 %vm69_vm1, %v52_v2  ;;  %637 = vmatpush.msk.msra.mxu3 %vm118_vm0, %v68_v0  ;;  %v53_v6 = vld [vmem:[%s1015_s1 + $0x8] sm:$0xff]  ;;  %v36_v10 = vld [vmem:[%s1016_s0 + $0x10] sm:$0xff] }
   0x4   :  { %v34_v4 = vld [vmem:[%s1016_s0] sm:$0xff]  ;;  %254 = vmatpush.msra.mxu1 %v50_v3  ;;  %601 = vmatmul.msk.f32.vlgmr.msra.gmra.mxu3 %vm69_vm1, %v65_v5  ;;  %v35_v7 = vld [vmem:[%s1016_s0 + $0x8] sm:$0xff]  ;;  %v67_v11 = vld [vmem:[%s1015_s1 + $0x78] sm:$0xff] }
   0x5   :  { %638 = vmatpush.msk.msrb.mxu3 %vm118_vm0, %v51_v1  ;;  %605 = vmatmul.msk.f32.vlgmr.msra.gmra.mxu1 %vm187_vm2, %v34_v4  ;;  %v55_v12 = vld [vmem:[%s1015_s1 + $0x18] sm:$0xff]  ;;  %v46_v14 = vld [vmem:[%s1016_s0 + $0x60] sm:$0xff]  ;;  %v47_v17 = vld [vmem:[%s1016_s0 + $0x68] sm:$0xff] }
   0x6   :  { %v37_v13 = vld [vmem:[%s1016_s0 + $0x18] sm:$0xff]  ;;  %v56_v15 = vld [vmem:[%s1015_s1 + $0x20] sm:$0xff]  ;;  %v57_v18 = vld [vmem:[%s1015_s1 + $0x28] sm:$0xff] }
   0x7   :  { %639 = vmatpush.msrb.mxu3 %v50_v3  ;;  %v38_v16 = vld [vmem:[%s1016_s0 + $0x20] sm:$0xff]  ;;  %v39_v19 = vld [vmem:[%s1016_s0 + $0x28] sm:$0xff]  ;;  %v48_v20 = vld [vmem:[%s1016_s0 + $0x70] sm:$0xff] }
   0x8   :  { %v58_v21 = vld [vmem:[%s1015_s1 + $0x30] sm:$0xff]  ;;  %v49_v23 = vld [vmem:[%s1016_s0 + $0x78] sm:$0xff]  ;;  %v60_v26 = vld [vmem:[%s1015_s1 + $0x40] sm:$0xff] }
   0x9   :  { %v40_v22 = vld [vmem:[%s1016_s0 + $0x30] sm:$0xff]  ;;  %v59_v24 = vld [vmem:[%s1015_s1 + $0x38] sm:$0xff]  ;;  %v42_v27 = vld [vmem:[%s1016_s0 + $0x40] sm:$0xff] }
   0xa   :  { %v41_v25 = vld [vmem:[%s1016_s0 + $0x38] sm:$0xff]  ;;  %v61_v28 = vld [vmem:[%s1015_s1 + $0x48] sm:$0xff]  ;;  %v62_v30 = vld [vmem:[%s1015_s1 + $0x50] sm:$0xff] }
   0xb   :  { %589 = vmatmul.msk.f32.gmra.mxu0 %vm69_vm1, %v53_v6  ;;  %v43_v29 = vld [vmem:[%s1016_s0 + $0x48] sm:$0xff]  ;;  %v44_v31 = vld [vmem:[%s1016_s0 + $0x50] sm:$0xff]  ;;  %v63_v32 = vld [vmem:[%s1015_s1 + $0x58] sm:$0xff] }
   0xc   :  { %602 = vmatmul.msk.f32.gmra.mxu3 %vm69_vm1, %v66_v8  ;;  %v45_v33 = vld [vmem:[%s1016_s0 + $0x58] sm:$0xff]  ;;  %v64_v34 = vld [vmem:[%s1015_s1 + $0x60] sm:$0xff]  ;;  %v342_v36 = vld [vmem:[%s1018_s5 + $0x10] sm:$0xff] }
   0xd   :  { %606 = vmatmul.msk.f32.gmra.mxu1 %vm187_vm2, %v35_v7  ;;  %v343_v35 = vld [vmem:[%s1018_s5 + $0x18] sm:$0xff]  ;;  %v341_v37 = vld [vmem:[%s1018_s5 + $0x8] sm:$0xff]  ;;  %v340_v38 = vld [vmem:[%s1018_s5] sm:$0xff] }
   0xe   :  { %409 = vmatpush.msra.mxu2 %v343_v35  ;;  %640 = vmatpush.msra.mxu3 %v343_v35  ;;  %v854_v40 = vld [vmem:[%s1017_s4] ss:$0 sm:$0xff] }
  0x10   :  { %410 = vmatpush.msra.mxu2 %v342_v36  ;;  %641 = vmatpush.msra.mxu3 %v342_v36 }
  0x12   :  { %411 = vmatpush.msra.mxu2 %v341_v37  ;;  %642 = vmatpush.msra.mxu3 %v341_v37 }
  0x13   :  { %590 = vmatmul.msk.f32.gmra.mxu0 %vm69_vm1, %v54_v9 }
  0x14   :  { %603 = vmatmul.msk.f32.gmra.mxu3 %vm69_vm1, %v67_v11  ;;  %412 = vmatpush.msra.mxu2 %v340_v38 }
  0x15   :  { %607 = vmatmul.msk.f32.gmra.mxu1 %vm187_vm2, %v36_v10  ;;  %643 = vmatpush.msra.mxu3 %v340_v38 }
  0x1b   :  { %591 = vmatmul.msk.f32.gmra.mxu0 %vm69_vm1, %v55_v12 }
  0x1c   :  { %617 = vmatmul.msk.f32.vlgmr.msrb.gmra.mxu3 %vm187_vm2, %v46_v14 }
  0x1d   :  { %608 = vmatmul.msk.f32.gmra.mxu1 %vm187_vm2, %v37_v13 }
  0x23   :  { %592 = vmatmul.msk.f32.gmra.mxu0 %vm69_vm1, %v56_v15 }
  0x24   :  { %618 = vmatmul.msk.f32.gmra.mxu3 %vm187_vm2, %v47_v17 }
  0x25   :  { %609 = vmatmul.msk.f32.gmra.mxu1 %vm187_vm2, %v38_v16 }
  0x2b   :  { %593 = vmatmul.msk.f32.gmra.mxu0 %vm69_vm1, %v57_v18 }
  0x2c   :  { %619 = vmatmul.msk.f32.gmra.mxu3 %vm187_vm2, %v48_v20 }
  0x2d   :  { %610 = vmatmul.msk.f32.gmra.mxu1 %vm187_vm2, %v39_v19 }
  0x33   :  { %594 = vmatmul.msk.f32.gmra.mxu0 %vm69_vm1, %v58_v21 }
  0x34   :  { %620 = vmatmul.msk.f32.gmra.mxu3 %vm187_vm2, %v49_v23 }
  0x35   :  { %611 = vmatmul.msk.f32.gmra.mxu1 %vm187_vm2, %v40_v22 }
  0x3b   :  { %595 = vmatmul.msk.f32.gmra.mxu0 %vm69_vm1, %v59_v24 }
  0x3d   :  { %612 = vmatmul.msk.f32.gmra.mxu1 %vm187_vm2, %v41_v25 }
  0x43   :  { %596 = vmatmul.msk.f32.gmra.mxu0 %vm69_vm1, %v60_v26 }
  0x45   :  { %613 = vmatmul.msk.f32.gmra.mxu1 %vm187_vm2, %v42_v27 }
  0x4b   :  { %597 = vmatmul.msk.f32.gmra.mxu0 %vm69_vm1, %v61_v28 }
  0x4d   :  { %614 = vmatmul.msk.f32.gmra.mxu1 %vm187_vm2, %v43_v29 }
  0x53   :  { %598 = vmatmul.msk.f32.gmra.mxu0 %vm69_vm1, %v62_v30 }
  0x55   :  { %615 = vmatmul.msk.f32.gmra.mxu1 %vm187_vm2, %v44_v31 }
  0x5b   :  { %599 = vmatmul.msk.f32.gmra.mxu0 %vm69_vm1, %v63_v32 }
  0x5d   :  { %616 = vmatmul.msk.f32.gmra.mxu1 %vm187_vm2, %v45_v33 }
  0x63   :  { %600 = vmatmul.msk.f32.gmra.mxu0 %vm69_vm1, %v64_v34 }
  0x80   :  { %v139_v39 = vpop.f32.mrf.mxu0 }
  0x82   :  { %v256_v41 = vpop.f32.mrf.mxu1 }
  0x83   :  { %v257_v42 = vadd.f32 %v256_v41, %v139_v39 }
  0x85   :  { %v308_v43 = vadd.f32 %v854_v40, %v257_v42 }
  0x87   :  { %v324_v44 = vmax.f32 %v308_v43, 0.0  ;;  %v178_v10 = vpop.f32.mrf.mxu3 }
  0x88   :  { %v142_v45 = vpop.f32.mrf.mxu0 }
  0x89   :  { %621 = vmatmul.msk.f32.vlgmr.msra.gmra.mxu2 %vm348_vm3, %v324_v44 }
  0x8a   :  { %v259_v46 = vpop.f32.mrf.mxu1 }
  0x8b   :  { %v260_v47 = vadd.f32 %v259_v46, %v142_v45 }
  0x8d   :  { %v309_v48 = vadd.f32 %v854_v40, %v260_v47 }
  0x8f   :  { %v325_v49 = vmax.f32 %v309_v48, 0.0  ;;  %v181_v17 = vpop.f32.mrf.mxu3 }
  0x90   :  { %v145_v50 = vpop.f32.mrf.mxu0 }
  0x91   :  { %622 = vmatmul.msk.f32.gmra.mxu2 %vm348_vm3, %v325_v49 }
  0x92   :  { %v262_v51 = vpop.f32.mrf.mxu1 }
  0x93   :  { %v263_v52 = vadd.f32 %v262_v51, %v145_v50 }
  0x95   :  { %v310_v53 = vadd.f32 %v854_v40, %v263_v52 }
  0x97   :  { %v326_v54 = vmax.f32 %v310_v53, 0.0  ;;  %v184_v24 = vpop.f32.mrf.mxu3 }
  0x98   :  { %v148_v55 = vpop.f32.mrf.mxu0 }
  0x99   :  { %623 = vmatmul.msk.f32.gmra.mxu2 %vm348_vm3, %v326_v54 }
  0x9a   :  { %v265_v56 = vpop.f32.mrf.mxu1 }
  0x9b   :  { %v266_v57 = vadd.f32 %v265_v56, %v148_v55 }
  0x9d   :  { %v311_v58 = vadd.f32 %v854_v40, %v266_v57  ;;  %v891_v57 = vld [vmem:[%s1019_s6] ss:$0 sm:$0xff] }
  0x9f   :  { %v327_v59 = vmax.f32 %v311_v58, 0.0  ;;  %v292_v32 = vpop.f32.mrf.mxu3 }
  0xa0   :  { %v151_v60 = vpop.f32.mrf.mxu0 }
  0xa1   :  { %624 = vmatmul.msk.f32.gmra.mxu2 %vm348_vm3, %v327_v59 }
  0xa2   :  { %v268_v61 = vpop.f32.mrf.mxu1 }
  0xa3   :  { %v269_v62 = vadd.f32 %v268_v61, %v151_v60  ;;  %v897_v60 = vld [vmem:[%s1020_s7] ss:$0 sm:$0xff] }
  0xa5   :  { %v312_v63 = vadd.f32 %v854_v40, %v269_v62 }
  0xa7   :  { %v328_v0 = vmax.f32 %v312_v63, 0.0  ;;  %v295_v39 = vpop.f32.mrf.mxu3 }
  0xa8   :  { %v154_v1 = vpop.f32.mrf.mxu0  ;;  %v296_v45 = vadd.f32 %v295_v39, %v178_v10 }
  0xa9   :  { %625 = vmatmul.msk.f32.gmra.mxu2 %vm348_vm3, %v328_v0 }
  0xaa   :  { %v271_v2 = vpop.f32.mrf.mxu1  ;;  %v321_v48 = vadd.f32 %v854_v40, %v296_v45 }
  0xab   :  { %v272_v3 = vadd.f32 %v271_v2, %v154_v1 }
  0xac   :  { %v337_v49 = vmax.f32 %v321_v48, 0.0 }
  0xad   :  { %v313_v4 = vadd.f32 %v854_v40, %v272_v3 }
  0xaf   :  { %v329_v5 = vmax.f32 %v313_v4, 0.0  ;;  %v298_v47 = vpop.f32.mrf.mxu3 }
  0xb0   :  { %v157_v6 = vpop.f32.mrf.mxu0  ;;  %v299_v50 = vadd.f32 %v298_v47, %v181_v17  ;;  %v14_v47 = vstv %s1021_s8 }
  0xb1   :  { %626 = vmatmul.msk.f32.gmra.mxu2 %vm348_vm3, %v329_v5  ;;  %15 = vst [vmem:[#allocation2] sm:$0x1] %v14_v47 }
  0xb2   :  { %v274_v7 = vpop.f32.mrf.mxu1  ;;  %v322_v51 = vadd.f32 %v854_v40, %v299_v50 }
  0xb3   :  { %v275_v8 = vadd.f32 %v274_v7, %v157_v6 }
  0xb4   :  { %v338_v53 = vmax.f32 %v322_v51, 0.0 }
  0xb5   :  { %v314_v9 = vadd.f32 %v854_v40, %v275_v8 }
  0xb7   :  { %v330_v11 = vmax.f32 %v314_v9, 0.0  ;;  %v301_v52 = vpop.f32.mrf.mxu3 }
  0xb8   :  { %v160_v12 = vpop.f32.mrf.mxu0  ;;  %v302_v54 = vadd.f32 %v301_v52, %v184_v24 }
  0xb9   :  { %627 = vmatmul.msk.f32.gmra.mxu2 %vm348_vm3, %v330_v11 }
  0xba   :  { %v277_v13 = vpop.f32.mrf.mxu1  ;;  %v323_v55 = vadd.f32 %v854_v40, %v302_v54 }
  0xbb   :  { %v278_v14 = vadd.f32 %v277_v13, %v160_v12 }
  0xbc   :  { %v339_v56 = vmax.f32 %v323_v55, 0.0 }
  0xbd   :  { %v315_v15 = vadd.f32 %v854_v40, %v278_v14 }
  0xbf   :  { %v331_v16 = vmax.f32 %v315_v15, 0.0 }
  0xc0   :  { %v163_v18 = vpop.f32.mrf.mxu0 }
  0xc1   :  { %628 = vmatmul.msk.f32.gmra.mxu2 %vm348_vm3, %v331_v16 }
  0xc2   :  { %v280_v19 = vpop.f32.mrf.mxu1 }
  0xc3   :  { %v281_v20 = vadd.f32 %v280_v19, %v163_v18 }
  0xc5   :  { %v316_v21 = vadd.f32 %v854_v40, %v281_v20 }
  0xc7   :  { %v332_v22 = vmax.f32 %v316_v21, 0.0 }
  0xc8   :  { %v166_v23 = vpop.f32.mrf.mxu0 }
  0xc9   :  { %629 = vmatmul.msk.f32.gmra.mxu2 %vm348_vm3, %v332_v22 }
  0xca   :  { %v283_v25 = vpop.f32.mrf.mxu1 }
  0xcb   :  { %v284_v26 = vadd.f32 %v283_v25, %v166_v23 }
  0xcd   :  { %v317_v27 = vadd.f32 %v854_v40, %v284_v26 }
  0xcf   :  { %v333_v28 = vmax.f32 %v317_v27, 0.0 }
  0xd0   :  { %v169_v29 = vpop.f32.mrf.mxu0 }
  0xd1   :  { %630 = vmatmul.msk.f32.gmra.mxu2 %vm348_vm3, %v333_v28 }
  0xd2   :  { %v286_v30 = vpop.f32.mrf.mxu1 }
  0xd3   :  { %v287_v31 = vadd.f32 %v286_v30, %v169_v29 }
  0xd5   :  { %v318_v33 = vadd.f32 %v854_v40, %v287_v31 }
  0xd7   :  { %v334_v34 = vmax.f32 %v318_v33, 0.0 }
  0xd8   :  { %v172_v35 = vpop.f32.mrf.mxu0 }
  0xd9   :  { %631 = vmatmul.msk.f32.gmra.mxu2 %vm348_vm3, %v334_v34 }
  0xda   :  { %v289_v36 = vpop.f32.mrf.mxu1 }
  0xdb   :  { %v290_v37 = vadd.f32 %v289_v36, %v172_v35 }
  0xdd   :  { %v319_v38 = vadd.f32 %v854_v40, %v290_v37 }
  0xdf   :  { %v335_v41 = vmax.f32 %v319_v38, 0.0 }
  0xe0   :  { %v175_v42 = vpop.f32.mrf.mxu0 }
  0xe1   :  { %v293_v43 = vadd.f32 %v292_v32, %v175_v42  ;;  %632 = vmatmul.msk.f32.gmra.mxu2 %vm348_vm3, %v335_v41 }
  0xe3   :  { %v320_v44 = vadd.f32 %v854_v40, %v293_v43 }
  0xe5   :  { %v336_v46 = vmax.f32 %v320_v44, 0.0 }
  0xe7   :  { %633 = vmatmul.msk.f32.vlgmr.msra.gmra.mxu3 %vm348_vm3, %v336_v46 }
  0xef   :  { %634 = vmatmul.msk.f32.gmra.mxu3 %vm348_vm3, %v337_v49 }
  0xf7   :  { %635 = vmatmul.msk.f32.gmra.mxu3 %vm348_vm3, %v338_v53 }
  0xff   :  { %636 = vmatmul.msk.f32.gmra.mxu3 %vm348_vm3, %v339_v56 }
 0x10c   :  { %v414_v58 = vpop.f32.mrf.mxu2 }
 0x10d   :  { %v415_v59 = vadd.f32 %v891_v57, %v414_v58 }
 0x10f   :  { %v462_v61 = vmax.f32 %v415_v59, 0.0 }
 0x111   :  { %v482_v62 = vmul.f32 %v897_v60, %v462_v61 }
 0x113   :  { %v498_v40 = vsel %vm348_vm3, %v482_v62, 0.0 }
 0x114   :  { %v417_v63 = vpop.f32.mrf.mxu2  ;;  %499 = vadd.xlane.f32.xlu0 %v498_v40 }
 0x115   :  { %v418_v0 = vadd.f32 %v891_v57, %v417_v63 }
 0x117   :  { %v463_v1 = vmax.f32 %v418_v0, 0.0 }
 0x119   :  { %v483_v2 = vmul.f32 %v897_v60, %v463_v1 }
 0x11b   :  { %v501_v3 = vsel %vm348_vm3, %v483_v2, 0.0 }
 0x11c   :  { %v420_v4 = vpop.f32.mrf.mxu2  ;;  %502 = vadd.xlane.f32.xlu0 %v501_v3 }
 0x11d   :  { %v421_v5 = vadd.f32 %v891_v57, %v420_v4 }
 0x11f   :  { %v464_v6 = vmax.f32 %v421_v5, 0.0 }
 0x121   :  { %v484_v7 = vmul.f32 %v897_v60, %v464_v6 }
 0x123   :  { %v504_v8 = vsel %vm348_vm3, %v484_v7, 0.0 }
 0x124   :  { %v423_v9 = vpop.f32.mrf.mxu2  ;;  %505 = vadd.xlane.f32.xlu1 %v504_v8 }
 0x125   :  { %v424_v10 = vadd.f32 %v891_v57, %v423_v9 }
 0x127   :  { %v465_v11 = vmax.f32 %v424_v10, 0.0  ;;  %v647_v10 = vld [vmem:[#allocation2] ss:$0 sm:$0xff] }
 0x129   :  { %v485_v12 = vmul.f32 %v897_v60, %v465_v11 }
 0x12b   :  { %v507_v13 = vsel %vm348_vm3, %v485_v12, 0.0 }
 0x12c   :  { %v426_v14 = vpop.f32.mrf.mxu2  ;;  %508 = vadd.xlane.f32.xlu1 %v507_v13 }
 0x12d   :  { %v427_v15 = vadd.f32 %v891_v57, %v426_v14 }
 0x12f   :  { %v466_v16 = vmax.f32 %v427_v15, 0.0 }
 0x131   :  { %v486_v17 = vmul.f32 %v897_v60, %v466_v16 }
 0x133   :  { %v510_v18 = vsel %vm348_vm3, %v486_v17, 0.0 }
 0x134   :  { %v429_v19 = vpop.f32.mrf.mxu2  ;;  %511 = vadd.xlane.f32.xlu2 %v510_v18 }
 0x135   :  { %v430_v20 = vadd.f32 %v891_v57, %v429_v19 }
 0x137   :  { %v467_v21 = vmax.f32 %v430_v20, 0.0 }
 0x139   :  { %v487_v22 = vmul.f32 %v897_v60, %v467_v21 }
 0x13b   :  { %v513_v23 = vsel %vm348_vm3, %v487_v22, 0.0 }
 0x13c   :  { %v432_v24 = vpop.f32.mrf.mxu2  ;;  %514 = vadd.xlane.f32.xlu2 %v513_v23 }
 0x13d   :  { %v433_v25 = vadd.f32 %v891_v57, %v432_v24 }
 0x13f   :  { %v468_v26 = vmax.f32 %v433_v25, 0.0 }
 0x141   :  { %v488_v27 = vmul.f32 %v897_v60, %v468_v26 }
 0x143   :  { %v516_v28 = vsel %vm348_vm3, %v488_v27, 0.0 }
 0x144   :  { %v435_v29 = vpop.f32.mrf.mxu2  ;;  %517 = vadd.xlane.f32.xlu0 %v516_v28 }
 0x145   :  { %v436_v30 = vadd.f32 %v891_v57, %v435_v29 }
 0x147   :  { %v469_v31 = vmax.f32 %v436_v30, 0.0 }
 0x149   :  { %v489_v32 = vmul.f32 %v897_v60, %v469_v31 }
 0x14b   :  { %v519_v33 = vsel %vm348_vm3, %v489_v32, 0.0 }
 0x14c   :  { %v438_v34 = vpop.f32.mrf.mxu2  ;;  %520 = vadd.xlane.f32.xlu1 %v519_v33 }
 0x14d   :  { %v439_v35 = vadd.f32 %v891_v57, %v438_v34 }
 0x14f   :  { %v470_v36 = vmax.f32 %v439_v35, 0.0 }
 0x151   :  { %v490_v37 = vmul.f32 %v897_v60, %v470_v36 }
 0x153   :  { %v522_v38 = vsel %vm348_vm3, %v490_v37, 0.0 }
 0x154   :  { %v441_v39 = vpop.f32.mrf.mxu2  ;;  %523 = vadd.xlane.f32.xlu2 %v522_v38 }
 0x155   :  { %v442_v41 = vadd.f32 %v891_v57, %v441_v39 }
 0x157   :  { %v471_v42 = vmax.f32 %v442_v41, 0.0 }
 0x159   :  { %v491_v43 = vmul.f32 %v897_v60, %v471_v42 }
 0x15b   :  { %v525_v44 = vsel %vm348_vm3, %v491_v43, 0.0 }
 0x15c   :  { %v444_v45 = vpop.f32.mrf.mxu2  ;;  %526 = vadd.xlane.f32.xlu0 %v525_v44 }
 0x15d   :  { %v445_v46 = vadd.f32 %v891_v57, %v444_v45 }
 0x15f   :  { %v472_v48 = vmax.f32 %v445_v46, 0.0 }
 0x161   :  { %v492_v49 = vmul.f32 %v897_v60, %v472_v48 }
 0x163   :  { %v528_v50 = vsel %vm348_vm3, %v492_v49, 0.0 }
 0x164   :  { %v447_v51 = vpop.f32.mrf.mxu2  ;;  %529 = vadd.xlane.f32.xlu1 %v528_v50 }
 0x165   :  { %v448_v52 = vadd.f32 %v891_v57, %v447_v51 }
 0x167   :  { %v473_v53 = vmax.f32 %v448_v52, 0.0 }
 0x169   :  { %v493_v54 = vmul.f32 %v897_v60, %v473_v53 }
 0x16a   :  { %v450_v55 = vpop.f32.mrf.mxu3 }
 0x16b   :  { %v451_v56 = vadd.f32 %v891_v57, %v450_v55  ;;  %v531_v58 = vsel %vm348_vm3, %v493_v54, 0.0 }
 0x16c   :  { %532 = vadd.xlane.f32.xlu2 %v531_v58 }
 0x16d   :  { %v474_v59 = vmax.f32 %v451_v56, 0.0 }
 0x16f   :  { %v494_v61 = vmul.f32 %v897_v60, %v474_v59 }
 0x171   :  { %v534_v62 = vsel %vm348_vm3, %v494_v61, 0.0 }
 0x172   :  { %v453_v40 = vpop.f32.mrf.mxu3  ;;  %535 = vadd.xlane.f32.xlu0 %v534_v62 }
 0x173   :  { %v454_v63 = vadd.f32 %v891_v57, %v453_v40 }
 0x175   :  { %v475_v0 = vmax.f32 %v454_v63, 0.0 }
 0x177   :  { %v495_v1 = vmul.f32 %v897_v60, %v475_v0 }
 0x179   :  { %v537_v2 = vsel %vm348_vm3, %v495_v1, 0.0 }
 0x17a   :  { %v456_v3 = vpop.f32.mrf.mxu3  ;;  %538 = vadd.xlane.f32.xlu1 %v537_v2 }
 0x17b   :  { %v457_v4 = vadd.f32 %v891_v57, %v456_v3 }
 0x17d   :  { %v476_v5 = vmax.f32 %v457_v4, 0.0 }
 0x17f   :  { %v496_v6 = vmul.f32 %v897_v60, %v476_v5 }
 0x181   :  { %v540_v7 = vsel %vm348_vm3, %v496_v6, 0.0 }
 0x182   :  { %v459_v8 = vpop.f32.mrf.mxu3  ;;  %541 = vadd.xlane.f32.xlu2 %v540_v7 }
 0x183   :  { %v460_v9 = vadd.f32 %v891_v57, %v459_v8 }
 0x185   :  { %v477_v11 = vmax.f32 %v460_v9, 0.0 }
 0x187   :  { %v500_v12 = vpop.xlane.xlu0 %499  ;;  %v497_v13 = vmul.f32 %v897_v60, %v477_v11 }
 0x188   :  { %v550_v14 = vadd.f32 %v647_v10, %v500_v12 }
 0x189   :  { %v543_v15 = vsel %vm348_vm3, %v497_v13, 0.0 }
 0x18a   :  { %567 = vst.msk [vmem:[%s1022_s9] sm:$0xff] %vm566_vm4, %v550_v14  ;;  %544 = vadd.xlane.f32.xlu0 %v543_v15 }
 0x18f   :  { %v503_v16 = vpop.xlane.xlu0 %502 }
 0x190   :  { %v551_v17 = vadd.f32 %v647_v10, %v503_v16 }
 0x192   :  { %568 = vst.msk [vmem:[%s1022_s9 + $0x8] sm:$0xff] %vm566_vm4, %v551_v17 }
 0x197   :  { %v506_v57 = vpop.xlane.xlu1 %505 }
 0x198   :  { %v552_v18 = vadd.f32 %v647_v10, %v506_v57 }
 0x19a   :  { %569 = vst.msk [vmem:[%s1022_s9 + $0x10] sm:$0xff] %vm566_vm4, %v552_v18 }
 0x19f   :  { %v509_v60 = vpop.xlane.xlu1 %508 }
 0x1a0   :  { %v553_v19 = vadd.f32 %v647_v10, %v509_v60 }
 0x1a2   :  { %570 = vst.msk [vmem:[%s1022_s9 + $0x18] sm:$0xff] %vm566_vm4, %v553_v19 }
 0x1a7   :  { %v512_v20 = vpop.xlane.xlu2 %511 }
 0x1a8   :  { %v554_v21 = vadd.f32 %v647_v10, %v512_v20 }
 0x1aa   :  { %571 = vst.msk [vmem:[%s1022_s9 + $0x20] sm:$0xff] %vm566_vm4, %v554_v21 }
 0x1af   :  { %v515_v22 = vpop.xlane.xlu2 %514 }
 0x1b0   :  { %v555_v23 = vadd.f32 %v647_v10, %v515_v22 }
 0x1b2   :  { %572 = vst.msk [vmem:[%s1022_s9 + $0x28] sm:$0xff] %vm566_vm4, %v555_v23 }
 0x1b7   :  { %v518_v24 = vpop.xlane.xlu0 %517 }
 0x1b8   :  { %v556_v25 = vadd.f32 %v647_v10, %v518_v24 }
 0x1ba   :  { %573 = vst.msk [vmem:[%s1022_s9 + $0x30] sm:$0xff] %vm566_vm4, %v556_v25 }
 0x1bf   :  { %v521_v26 = vpop.xlane.xlu1 %520 }
 0x1c0   :  { %v557_v27 = vadd.f32 %v647_v10, %v521_v26 }
 0x1c2   :  { %574 = vst.msk [vmem:[%s1022_s9 + $0x38] sm:$0xff] %vm566_vm4, %v557_v27 }
 0x1c7   :  { %v524_v28 = vpop.xlane.xlu2 %523 }
 0x1c8   :  { %v558_v29 = vadd.f32 %v647_v10, %v524_v28 }
 0x1ca   :  { %575 = vst.msk [vmem:[%s1022_s9 + $0x40] sm:$0xff] %vm566_vm4, %v558_v29 }
 0x1cf   :  { %v527_v30 = vpop.xlane.xlu0 %526 }
 0x1d0   :  { %v559_v31 = vadd.f32 %v647_v10, %v527_v30 }
 0x1d2   :  { %576 = vst.msk [vmem:[%s1022_s9 + $0x48] sm:$0xff] %vm566_vm4, %v559_v31 }
 0x1d7   :  { %v530_v32 = vpop.xlane.xlu1 %529 }
 0x1d8   :  { %v560_v33 = vadd.f32 %v647_v10, %v530_v32 }
 0x1da   :  { %577 = vst.msk [vmem:[%s1022_s9 + $0x50] sm:$0xff] %vm566_vm4, %v560_v33 }
 0x1df   :  { %v533_v34 = vpop.xlane.xlu2 %532 }
 0x1e0   :  { %v561_v35 = vadd.f32 %v647_v10, %v533_v34 }
 0x1e2   :  { %578 = vst.msk [vmem:[%s1022_s9 + $0x58] sm:$0xff] %vm566_vm4, %v561_v35 }
 0x1e5   :  { %v536_v36 = vpop.xlane.xlu0 %535 }
 0x1e6   :  { %v562_v37 = vadd.f32 %v647_v10, %v536_v36 }
 0x1e8   :  { %579 = vst.msk [vmem:[%s1022_s9 + $0x60] sm:$0xff] %vm566_vm4, %v562_v37 }
 0x1ed   :  { %v539_v38 = vpop.xlane.xlu1 %538 }
 0x1ee   :  { %v563_v39 = vadd.f32 %v647_v10, %v539_v38 }
 0x1f0   :  { %580 = vst.msk [vmem:[%s1022_s9 + $0x68] sm:$0xff] %vm566_vm4, %v563_v39 }
 0x1f5   :  { %v542_v41 = vpop.xlane.xlu2 %541 }
 0x1f6   :  { %v564_v42 = vadd.f32 %v647_v10, %v542_v41 }
 0x1f8   :  { %581 = vst.msk [vmem:[%s1022_s9 + $0x70] sm:$0xff] %vm566_vm4, %v564_v42 }
 0x1fd   :  { %v545_v43 = vpop.xlane.xlu0 %544 }
 0x1fe   :  { %v565_v44 = vadd.f32 %v647_v10, %v545_v43 }
 0x200   :  { %582 = vst.msk [vmem:[%s1022_s9 + $0x78] sm:$0xff] %vm566_vm4, %v565_v44 }

</bundles_post_ra>
